<compile_context>
chip_gen: v6e
topology: v6e:2x2x1
jax: 0.10.0
libtpu: 0.0.40
codegen_flags: <defaults>
</compile_context>

<pallas_src>
import numpy as np
import jax
import jax.numpy as jnp
from jax.experimental import pallas as pl
from jax.experimental.pallas import tpu as pltpu


# ------------------------------------------------------------------ kernel

def _fused_forward_kernel(cw_ref, w1_ref, t1_ref, w2_ref, t2_ref, w3_ref, t3_ref,
                          m3_ref, ut_ref, o_ref):
    """Whole-network forward for ONE image (the grid iterates over the batch).

    Layout contract (built by the wrapper):
      * cw_ref: (1, P1, 4)  -- for every layer-1 pooled position (P1 = H/2*W/2, ordered
        "corner-major" w.r.t. the downstream poolings), the 4 input-window values on lanes.
      * positions always live on the sublane axis; channels / window corners on lanes.
      * m3_ref: (P2, P3) 0/1 membership of each layer-2-pooled position in its 2x2 window.
      * ut_ref: (P3, H*W) composed x8 bilinear upsample matrix (lane-dense output).
    """
    p2 = m3_ref.shape[0]                                   # positions after the 2nd pool

    # ---- layer 1: 1x1 conv (Cin=1 -> C1) + BN + ReLU + 2x2 max-pool (exact max/min trick).
    cw = cw_ref[0]                                         # (P1, 4)
    xmax = jnp.max(cw, axis=1, keepdims=True)              # (P1, 1)
    xmin = jnp.min(cw, axis=1, keepdims=True)              # (P1, 1)
    w1 = w1_ref[...]                                       # (1, C1)  BN-folded weight
    a1 = jnp.maximum(jnp.maximum(xmax * w1, xmin * w1) + t1_ref[...], 0.0)    # (P1, C1)

    # ---- layer 2: 1x1 conv (C1 -> 1) + BN + ReLU on the VPU (no MXU round-trip) ...
    z2 = jnp.maximum(jnp.sum(a1 * w2_ref[...], axis=1, keepdims=True)
                     + t2_ref[...], 0.0)                                       # (P1, 1)
    # ... then 2x2 max-pool: corner-major position ordering makes the four pooling corners
    # contiguous, 8-aligned sublane slices.
    z2p = jnp.maximum(jnp.maximum(z2[0:p2], z2[p2:2 * p2]),
                      jnp.maximum(z2[2 * p2:3 * p2], z2[3 * p2:4 * p2]))       # (P2, 1)

    # ---- layer 3: 1x1 conv (1 -> 1) + BN + ReLU + 2x2 max-pool (same exact trick); the
    # window grouping is done with a masked sublane reduction (no unaligned slices).
    m3 = m3_ref[...]                                       # (P2, P3)
    zmax = jnp.max(jnp.where(m3 > 0.5, z2p, -1e30), axis=0, keepdims=True)     # (1, P3)
    zmin = jnp.min(jnp.where(m3 > 0.5, z2p, 1e30), axis=0, keepdims=True)      # (1, P3)
    w3 = w3_ref[...]                                       # (1, 1)
    a3 = jnp.maximum(jnp.maximum(zmax * w3, zmin * w3) + t3_ref[...], 0.0)     # (1, P3)

    # ---- fused x8 bilinear upsample (align_corners=True): one lane-dense dot.
    o_ref[0] = jnp.dot(a3, ut_ref[...], preferred_element_type=jnp.float32)    # (1, H*W)


# ------------------------------------------------------------------ constant tables

def _interp_matrix_np(n_in, n_out):
    # PyTorch F.interpolate(mode='bilinear', align_corners=True) 1-D weights.
    dst = np.arange(n_out, dtype=np.float64)
    src = np.zeros_like(dst) if n_out == 1 else dst * (n_in - 1) / (n_out - 1)
    i0 = np.clip(np.floor(src).astype(np.int64), 0, n_in - 1)
    i1 = np.clip(i0 + 1, 0, n_in - 1)
    frac = src - i0
    A = np.zeros((n_out, n_in), dtype=np.float64)
    A[np.arange(n_out), i0] += 1.0 - frac
    A[np.arange(n_out), i1] += frac
    return A


def _composed_upsample_matrix_np(n_in, steps):
    A = np.eye(n_in, dtype=np.float64)
    n = n_in
    for _ in range(steps):
        A = _interp_matrix_np(n, 2 * n) @ A
        n *= 2
    return A                                               # (n_in * 2**steps, n_in)


def _pipeline_index_tables(H, W):
    """Build (idx, m3, ut) for the fused kernel:
         idx: (P1, 4) int32 -- flat input indices of each first-pool 2x2 window, with the
              P1 positions ordered corner-major w.r.t. the 2nd and 3rd poolings;
         m3 : (P2, P3) f32  -- membership mask for the 3rd pooling;
         ut : (P3, H*W) f32 -- composed x8 bilinear upsample matrix (2x2 grid -> HxW)."""
    H1, W1 = H // 2, W // 2
    H2, W2 = H1 // 2, W1 // 2
    H3, W3 = H2 // 2, W2 // 2
    P1, P2, P3 = H1 * W1, H2 * W2, H3 * W3
    idx = np.zeros((P1, 4), dtype=np.int32)
    for i1 in range(H1):
        for j1 in range(W1):
            i2, j2 = i1 // 2, j1 // 2
            k2 = (i1 % 2) * 2 + (j1 % 2)                   # corner inside the 2nd pooling
            i3, j3 = i2 // 2, j2 // 2
            k3 = (i2 % 2) * 2 + (j2 % 2)                   # corner inside the 3rd pooling
            g3 = i3 * W3 + j3                              # row-major over the 2x2 grid
            g2 = k3 * P3 + g3                              # corner-major over the 4x4 grid
            p1 = k2 * P2 + g2                              # corner-major over the 8x8 grid
            for a in range(2):
                for b in range(2):
                    idx[p1, a * 2 + b] = (2 * i1 + a) * W + (2 * j1 + b)
    g2_idx = np.arange(P2)
    m3 = (g2_idx[:, None] % P3 == np.arange(P3)[None, :]).astype(np.float32)  # (P2, P3)
    A_h = _composed_upsample_matrix_np(H3, 3)              # (H, H3)
    A_w = _composed_upsample_matrix_np(W3, 3)              # (W, W3)
    ut = np.kron(A_h, A_w).T.astype(np.float32)            # (P3, H*W)
    return idx, m3, ut


# ------------------------------------------------------------------ wrapper

def _fold_bn(w, b, gamma, beta, mean, var, eps=1e-5):
    """Fold BatchNorm (eval mode) into a 1x1 conv: y = x @ (w*s) + ((b-mean)*s + beta)."""
    s = gamma / jnp.sqrt(var + eps)
    return (w * s[None, :]).astype(jnp.float32), ((b - mean) * s + beta).astype(jnp.float32)


def simple_conv_net_forward(x_nchw, params, eps=1e-5):
    N, Cin, H, W = x_nchw.shape
    C1 = params[0]["w"].shape[1]
    assert Cin == 1 and H % 8 == 0 and W % 8 == 0, "fused path: n_channels=1, H,W % 8 == 0"
    assert params[1]["w"].shape == (C1, 1) and params[2]["w"].shape == (1, 1), \
        "fused path assumes bw == 1 (conv2: C1->1, conv3: 1->1)"

    idx, m3, ut = _pipeline_index_tables(H, W)
    P1, P2, P3, HW = idx.shape[0], m3.shape[0], ut.shape[0], H * W

    w1, t1 = _fold_bn(params[0]["w"], params[0]["b"], params[0]["gamma"], params[0]["beta"],
                      params[0]["mean"], params[0]["var"], eps)
    w2, t2 = _fold_bn(params[1]["w"], params[1]["b"], params[1]["gamma"], params[1]["beta"],
                      params[1]["mean"], params[1]["var"], eps)
    w3, t3 = _fold_bn(params[2]["w"], params[2]["b"], params[2]["gamma"], params[2]["beta"],
                      params[2]["mean"], params[2]["var"], eps)
    w1f, t1f = w1.reshape(1, C1), t1.reshape(1, C1)
    w2f, t2f = w2.reshape(1, C1), t2.reshape(1, 1)
    w3f, t3f = w3.reshape(1, 1), t3.reshape(1, 1)

    # One gathered window tensor (N, P1, 4): the only input the kernel needs.
    xflat = x_nchw.reshape(N, HW).astype(jnp.float32)
    cw = xflat[:, jnp.asarray(idx)]                        # (N, P1, 4)

    out = pl.pallas_call(
        _fused_forward_kernel,
        out_shape=jax.ShapeDtypeStruct((N, 1, HW), jnp.float32),
        grid=(N,),
        in_specs=[
            pl.BlockSpec((1, P1, 4), lambda n: (n, 0, 0)),     # per-image window tensor
            pl.BlockSpec((1, C1), lambda n: (0, 0)),           # w1 (resident)
            pl.BlockSpec((1, C1), lambda n: (0, 0)),           # t1
            pl.BlockSpec((1, C1), lambda n: (0, 0)),           # w2
            pl.BlockSpec((1, 1), lambda n: (0, 0)),            # t2
            pl.BlockSpec((1, 1), lambda n: (0, 0)),            # w3
            pl.BlockSpec((1, 1), lambda n: (0, 0)),            # t3
            pl.BlockSpec((P2, P3), lambda n: (0, 0)),          # pooling mask
            pl.BlockSpec((P3, HW), lambda n: (0, 0)),          # upsample matrix
        ],
        out_specs=pl.BlockSpec((1, 1, HW), lambda n: (n, 0, 0)),
        compiler_params=pltpu.CompilerParams(dimension_semantics=("parallel",)),
    )(cw, w1f, t1f, w2f, t2f, w3f, t3f, jnp.asarray(m3), jnp.asarray(ut))

    return out.reshape(N, 1, H, W)                         # NCHW, single output channel


# ------------------------------------------------------------------ model params

def init_params(key, bw=1, n_channels=1):
    dims = [(n_channels, bw * 32), (bw * 32, bw), (bw, bw)]
    params = []
    for (cin, cout) in dims:
        key, kw, kb, kg, kbt, km, kv = jax.random.split(key, 7)
        # PyTorch conv weight is (Cout, Cin, 1, 1); store as (Cin, Cout) for the matmul form.
        w_pt = jax.random.normal(kw, (cout, cin, 1, 1), jnp.float32) * 0.1
        params.append(dict(
            w=jnp.transpose(w_pt[:, :, 0, 0], (1, 0)),
            b=jax.random.normal(kb, (cout,), jnp.float32) * 0.05,
            gamma=1.0 + 0.1 * jax.random.normal(kg, (cout,), jnp.float32),
            beta=0.05 * jax.random.normal(kbt, (cout,), jnp.float32),
            mean=0.05 * jax.random.normal(km, (cout,), jnp.float32),
            var=1.0 + 0.1 * jax.nn.sigmoid(jax.random.normal(kv, (cout,), jnp.float32)),
        ))
    return params


# ------------------------------------------------------------------ pure-JAX reference

def reference_forward(x_nchw, params, eps=1e-5):
    x = jnp.transpose(x_nchw, (0, 2, 3, 1)).astype(jnp.float32)
    for p in params:
        y = jnp.einsum('nhwc,cd->nhwd', x, p["w"]) + p["b"]
        s = p["gamma"] / jnp.sqrt(p["var"] + eps)
        y = y * s + (p["beta"] - p["mean"] * s)
        x = jnp.maximum(y, 0.0)
        N, H, W_, C = x.shape
        x = x.reshape(N, H // 2, 2, W_ // 2, 2, C).max(axis=(2, 4))
    for _ in range(3):
        N, H, W_, C = x.shape
        A_h = jnp.asarray(_interp_matrix_np(H, 2 * H).astype(np.float32))
        A_w = jnp.asarray(_interp_matrix_np(W_, 2 * W_).astype(np.float32))
        x = jnp.einsum('oh,nhwc->nowc', A_h, x)
        x = jnp.einsum('pw,nowc->nopc', A_w, x)
    return jnp.transpose(x, (0, 3, 1, 2))


if __name__ == "__main__":
    key = jax.random.PRNGKey(0)
    kx, kp = jax.random.split(key)
    # bw=1, n_channels=1 (module defaults); spatial 16x16, batch 2.
    x = jax.random.normal(kx, (2, 1, 16, 16), jnp.float32)
    params = init_params(kp, bw=1, n_channels=1)

    fwd = jax.jit(simple_conv_net_forward)
    out = jax.block_until_ready(fwd(x, params))

    ref = reference_forward(x, params)
    assert out.shape == (2, 1, 16, 16), out.shape
    err = float(jnp.max(jnp.abs(out - ref)))
    assert jnp.allclose(out, ref, atol=1e-4, rtol=1e-4), err
    print("KERNEL_OK")
</pallas_src>

<mosaic_0001>
module attributes {stable_mosaic.version = 11 : i64} {
  func.func @_fused_forward_kernel(%arg0: i32, %arg1: memref<1x64x4xf32, #tpu.memory_space<vmem>>, %arg2: memref<1x32xf32, #tpu.memory_space<vmem>>, %arg3: memref<1x32xf32, #tpu.memory_space<vmem>>, %arg4: memref<1x32xf32, #tpu.memory_space<vmem>>, %arg5: memref<1x1xf32, #tpu.memory_space<vmem>>, %arg6: memref<1x1xf32, #tpu.memory_space<vmem>>, %arg7: memref<1x1xf32, #tpu.memory_space<vmem>>, %arg8: memref<16x4xf32, #tpu.memory_space<vmem>>, %arg9: memref<4x256xf32, #tpu.memory_space<vmem>>, %arg10: memref<1x1x256xf32, #tpu.memory_space<vmem>>) attributes {dimension_semantics = [#tpu.dimension_semantics<parallel>], iteration_bounds = array<i64: 2>, scalar_prefetch = 0 : i64, scratch_operands = 0 : i64, tpu.core_type = #tpu.core_type<tc>, window_params = [{transform_indices = @transform_0, window_bounds = array<i64: 1, 64, 4>}, {pipeline_mode = #tpu.pipeline_mode<synchronous>, transform_indices = @transform_1, window_bounds = array<i64: 1, 32>}, {pipeline_mode = #tpu.pipeline_mode<synchronous>, transform_indices = @transform_2, window_bounds = array<i64: 1, 32>}, {pipeline_mode = #tpu.pipeline_mode<synchronous>, transform_indices = @transform_3, window_bounds = array<i64: 1, 32>}, {pipeline_mode = #tpu.pipeline_mode<synchronous>, transform_indices = @transform_4, window_bounds = array<i64: 1, 1>}, {pipeline_mode = #tpu.pipeline_mode<synchronous>, transform_indices = @transform_5, window_bounds = array<i64: 1, 1>}, {pipeline_mode = #tpu.pipeline_mode<synchronous>, transform_indices = @transform_6, window_bounds = array<i64: 1, 1>}, {pipeline_mode = #tpu.pipeline_mode<synchronous>, transform_indices = @transform_7, window_bounds = array<i64: 16, 4>}, {pipeline_mode = #tpu.pipeline_mode<synchronous>, transform_indices = @transform_8, window_bounds = array<i64: 4, 256>}, {transform_indices = @transform_9, window_bounds = array<i64: 1, 1, 256>}]} {
    %c0 = arith.constant 0 : index
    %c0_0 = arith.constant 0 : index
    %c0_1 = arith.constant 0 : index
    %0 = vector.load %arg1[%c0, %c0_0, %c0_1] : memref<1x64x4xf32, #tpu.memory_space<vmem>>, vector<1x64x4xf32>
    %1 = vector.shape_cast %0 : vector<1x64x4xf32> to vector<64x4xf32>
    %cst = arith.constant dense<0xFF800000> : vector<64xf32>
    %2 = vector.multi_reduction <maximumf>, %1, %cst [1] : vector<64x4xf32> to vector<64xf32>
    %3 = vector.shape_cast %2 : vector<64xf32> to vector<64x1xf32>
    %cst_2 = arith.constant dense<0x7F800000> : vector<64xf32>
    %4 = vector.multi_reduction <minimumf>, %1, %cst_2 [1] : vector<64x4xf32> to vector<64xf32>
    %5 = vector.shape_cast %4 : vector<64xf32> to vector<64x1xf32>
    %c0_3 = arith.constant 0 : index
    %c0_4 = arith.constant 0 : index
    %6 = vector.load %arg2[%c0_3, %c0_4] : memref<1x32xf32, #tpu.memory_space<vmem>>, vector<1x32xf32>
    %7 = vector.broadcast %3 : vector<64x1xf32> to vector<64x32xf32>
    %8 = vector.broadcast %6 : vector<1x32xf32> to vector<64x32xf32>
    %9 = arith.mulf %7, %8 : vector<64x32xf32>
    %10 = vector.broadcast %5 : vector<64x1xf32> to vector<64x32xf32>
    %11 = vector.broadcast %6 : vector<1x32xf32> to vector<64x32xf32>
    %12 = arith.mulf %10, %11 : vector<64x32xf32>
    %13 = arith.maximumf %9, %12 : vector<64x32xf32>
    %c0_5 = arith.constant 0 : index
    %c0_6 = arith.constant 0 : index
    %14 = vector.load %arg3[%c0_5, %c0_6] : memref<1x32xf32, #tpu.memory_space<vmem>>, vector<1x32xf32>
    %15 = vector.broadcast %14 : vector<1x32xf32> to vector<64x32xf32>
    %16 = arith.addf %13, %15 : vector<64x32xf32>
    %cst_7 = arith.constant 0.000000e+00 : f32
    %17 = vector.broadcast %cst_7 : f32 to vector<64x32xf32>
    %18 = arith.maximumf %16, %17 : vector<64x32xf32>
    %c0_8 = arith.constant 0 : index
    %c0_9 = arith.constant 0 : index
    %19 = vector.load %arg4[%c0_8, %c0_9] : memref<1x32xf32, #tpu.memory_space<vmem>>, vector<1x32xf32>
    %20 = vector.broadcast %19 : vector<1x32xf32> to vector<64x32xf32>
    %21 = arith.mulf %18, %20 : vector<64x32xf32>
    %cst_10 = arith.constant dense<0.000000e+00> : vector<64xf32>
    %22 = vector.multi_reduction <add>, %21, %cst_10 [1] : vector<64x32xf32> to vector<64xf32>
    %23 = vector.shape_cast %22 : vector<64xf32> to vector<64x1xf32>
    %c0_11 = arith.constant 0 : index
    %c0_12 = arith.constant 0 : index
    %24 = vector.load %arg5[%c0_11, %c0_12] : memref<1x1xf32, #tpu.memory_space<vmem>>, vector<1x1xf32>
    %25 = vector.broadcast %24 : vector<1x1xf32> to vector<64x1xf32>
    %26 = arith.addf %23, %25 : vector<64x1xf32>
    %cst_13 = arith.constant 0.000000e+00 : f32
    %27 = vector.broadcast %cst_13 : f32 to vector<64x1xf32>
    %28 = arith.maximumf %26, %27 : vector<64x1xf32>
    %29 = vector.extract_strided_slice %28 {offsets = [0, 0], sizes = [16, 1], strides = [1, 1]} : vector<64x1xf32> to vector<16x1xf32>
    %30 = vector.extract_strided_slice %28 {offsets = [16, 0], sizes = [16, 1], strides = [1, 1]} : vector<64x1xf32> to vector<16x1xf32>
    %31 = arith.maximumf %29, %30 : vector<16x1xf32>
    %32 = vector.extract_strided_slice %28 {offsets = [32, 0], sizes = [16, 1], strides = [1, 1]} : vector<64x1xf32> to vector<16x1xf32>
    %33 = vector.extract_strided_slice %28 {offsets = [48, 0], sizes = [16, 1], strides = [1, 1]} : vector<64x1xf32> to vector<16x1xf32>
    %34 = arith.maximumf %32, %33 : vector<16x1xf32>
    %35 = arith.maximumf %31, %34 : vector<16x1xf32>
    %c0_14 = arith.constant 0 : index
    %c0_15 = arith.constant 0 : index
    %36 = vector.load %arg8[%c0_14, %c0_15] : memref<16x4xf32, #tpu.memory_space<vmem>>, vector<16x4xf32>
    %cst_16 = arith.constant 5.000000e-01 : f32
    %37 = vector.broadcast %cst_16 : f32 to vector<16x4xf32>
    %38 = arith.cmpf ogt, %36, %37 : vector<16x4xf32>
    %cst_17 = arith.constant -1.000000e+30 : f32
    %39 = vector.shape_cast %35 : vector<16x1xf32> to vector<16x1xf32>
    %40 = vector.broadcast %39 : vector<16x1xf32> to vector<16x4xf32>
    %41 = vector.broadcast %cst_17 : f32 to vector<16x4xf32>
    %42 = arith.select %38, %40, %41 : vector<16x4xi1>, vector<16x4xf32>
    %cst_18 = arith.constant dense<0xFF800000> : vector<4xf32>
    %43 = vector.multi_reduction <maximumf>, %42, %cst_18 [0] : vector<16x4xf32> to vector<4xf32>
    %44 = vector.shape_cast %43 : vector<4xf32> to vector<1x4xf32>
    %cst_19 = arith.constant 5.000000e-01 : f32
    %45 = vector.broadcast %cst_19 : f32 to vector<16x4xf32>
    %46 = arith.cmpf ogt, %36, %45 : vector<16x4xf32>
    %cst_20 = arith.constant 1.000000e+30 : f32
    %47 = vector.shape_cast %35 : vector<16x1xf32> to vector<16x1xf32>
    %48 = vector.broadcast %47 : vector<16x1xf32> to vector<16x4xf32>
    %49 = vector.broadcast %cst_20 : f32 to vector<16x4xf32>
    %50 = arith.select %46, %48, %49 : vector<16x4xi1>, vector<16x4xf32>
    %cst_21 = arith.constant dense<0x7F800000> : vector<4xf32>
    %51 = vector.multi_reduction <minimumf>, %50, %cst_21 [0] : vector<16x4xf32> to vector<4xf32>
    %52 = vector.shape_cast %51 : vector<4xf32> to vector<1x4xf32>
    %c0_22 = arith.constant 0 : index
    %c0_23 = arith.constant 0 : index
    %53 = vector.load %arg6[%c0_22, %c0_23] : memref<1x1xf32, #tpu.memory_space<vmem>>, vector<1x1xf32>
    %54 = vector.broadcast %53 : vector<1x1xf32> to vector<1x4xf32>
    %55 = arith.mulf %44, %54 : vector<1x4xf32>
    %56 = vector.broadcast %53 : vector<1x1xf32> to vector<1x4xf32>
    %57 = arith.mulf %52, %56 : vector<1x4xf32>
    %58 = arith.maximumf %55, %57 : vector<1x4xf32>
    %c0_24 = arith.constant 0 : index
    %c0_25 = arith.constant 0 : index
    %59 = vector.load %arg7[%c0_24, %c0_25] : memref<1x1xf32, #tpu.memory_space<vmem>>, vector<1x1xf32>
    %60 = vector.broadcast %59 : vector<1x1xf32> to vector<1x4xf32>
    %61 = arith.addf %58, %60 : vector<1x4xf32>
    %cst_26 = arith.constant 0.000000e+00 : f32
    %62 = vector.broadcast %cst_26 : f32 to vector<1x4xf32>
    %63 = arith.maximumf %61, %62 : vector<1x4xf32>
    %c0_27 = arith.constant 0 : index
    %c0_28 = arith.constant 0 : index
    %64 = vector.load %arg9[%c0_27, %c0_28] : memref<4x256xf32, #tpu.memory_space<vmem>>, vector<4x256xf32>
    %cst_29 = arith.constant dense<0.000000e+00> : vector<1x256xf32>
    %65 = tpu.matmul %63, %64, %cst_29 {dimension_numbers = #tpu.dot_dimension_numbers<[1], [0], [0], [1], [0, 0, 1, 1], [], []>} : vector<1x4xf32>, vector<4x256xf32>, vector<1x256xf32> -> vector<1x256xf32>
    %c0_30 = arith.constant 0 : index
    %c0_31 = arith.constant 0 : index
    %c0_32 = arith.constant 0 : index
    %66 = vector.load %arg10[%c0_30, %c0_31, %c0_32] : memref<1x1x256xf32, #tpu.memory_space<vmem>>, vector<1x1x256xf32>
    %67 = vector.shape_cast %66 : vector<1x1x256xf32> to vector<1x256xf32>
    %68 = vector.shape_cast %65 : vector<1x256xf32> to vector<1x1x256xf32>
    tpu.vector_store %arg10[%c0_30, %c0_31, %c0_32], %68 {strides = array<i32>} : memref<1x1x256xf32, #tpu.memory_space<vmem>>, vector<1x1x256xf32>,
    return
  }
  func.func @transform_0(%arg0: i32) -> (i32, i32, i32) {
    %c0_i32 = arith.constant 0 : i32
    %c0_i32_0 = arith.constant 0 : i32
    %c0_i32_1 = arith.constant 0 : i32
    return %arg0, %c0_i32, %c0_i32_0 : i32, i32, i32
  }
  func.func @transform_1(%arg0: i32) -> (i32, i32) {
    %c0_i32 = arith.constant 0 : i32
    %c0_i32_0 = arith.constant 0 : i32
    %c0_i32_1 = arith.constant 0 : i32
    return %c0_i32, %c0_i32_0 : i32, i32
  }
  func.func @transform_2(%arg0: i32) -> (i32, i32) {
    %c0_i32 = arith.constant 0 : i32
    %c0_i32_0 = arith.constant 0 : i32
    %c0_i32_1 = arith.constant 0 : i32
    return %c0_i32, %c0_i32_0 : i32, i32
  }
  func.func @transform_3(%arg0: i32) -> (i32, i32) {
    %c0_i32 = arith.constant 0 : i32
    %c0_i32_0 = arith.constant 0 : i32
    %c0_i32_1 = arith.constant 0 : i32
    return %c0_i32, %c0_i32_0 : i32, i32
  }
  func.func @transform_4(%arg0: i32) -> (i32, i32) {
    %c0_i32 = arith.constant 0 : i32
    %c0_i32_0 = arith.constant 0 : i32
    %c0_i32_1 = arith.constant 0 : i32
    return %c0_i32, %c0_i32_0 : i32, i32
  }
  func.func @transform_5(%arg0: i32) -> (i32, i32) {
    %c0_i32 = arith.constant 0 : i32
    %c0_i32_0 = arith.constant 0 : i32
    %c0_i32_1 = arith.constant 0 : i32
    return %c0_i32, %c0_i32_0 : i32, i32
  }
  func.func @transform_6(%arg0: i32) -> (i32, i32) {
    %c0_i32 = arith.constant 0 : i32
    %c0_i32_0 = arith.constant 0 : i32
    %c0_i32_1 = arith.constant 0 : i32
    return %c0_i32, %c0_i32_0 : i32, i32
  }
  func.func @transform_7(%arg0: i32) -> (i32, i32) {
    %c0_i32 = arith.constant 0 : i32
    %c0_i32_0 = arith.constant 0 : i32
    %c0_i32_1 = arith.constant 0 : i32
    return %c0_i32, %c0_i32_0 : i32, i32
  }
  func.func @transform_8(%arg0: i32) -> (i32, i32) {
    %c0_i32 = arith.constant 0 : i32
    %c0_i32_0 = arith.constant 0 : i32
    %c0_i32_1 = arith.constant 0 : i32
    return %c0_i32, %c0_i32_0 : i32, i32
  }
  func.func @transform_9(%arg0: i32) -> (i32, i32, i32) {
    %c0_i32 = arith.constant 0 : i32
    %c0_i32_0 = arith.constant 0 : i32
    %c0_i32_1 = arith.constant 0 : i32
    return %arg0, %c0_i32, %c0_i32_0 : i32, i32, i32
  }
}

</mosaic_0001>

<bundles_post_ra>
// kernel: simple_conv_net_forward.1
= control target key start
LH: loop header
LB: loop body
LE: loop exit
PB: predicated region body
PF: predicated region fallthrough
CT: control target
= control target key end

     0   :  { %s838_s15 = smov 0   ;;  %s906_s0 = inlined_call_operand.vmem [shape: f32[2,64,4], index: 0, kind: input, shape index: {}]   ;;  %s907_s1 = inlined_call_operand.vmem [shape: f32[1,32], index: 1, kind: input, shape index: {}]   ;;  %s908_s2 = inlined_call_operand.vmem [shape: f32[1,32], index: 2, kind: input, shape index: {}]   ;;  %s909_s3 = inlined_call_operand.vmem [shape: f32[1,32], index: 3, kind: input, shape index: {}]   ;;  %s910_s4 = inlined_call_operand.<no memory space> [shape: f32[1,1], index: 4, kind: input, shape index: {}]   ;;  %s911_s7 = inlined_call_operand.vmem [shape: f32[16,4], index: 7, kind: input, shape index: {}]   ;;  %s912_s8 = inlined_call_operand.vmem [shape: f32[4,256], index: 8, kind: input, shape index: {}]   ;;  %s913_s9 = inlined_call_operand.vmem [shape: f32[2,1,256], index: 9, kind: output, shape index: {}]   ;;  %s914_s5 = inlined_call_operand.<no memory space> [shape: f32[1,1], index: 5, kind: input, shape index: {}]   ;;  %s915_s6 = inlined_call_operand.<no memory space> [shape: f32[1,1], index: 6, kind: input, shape index: {}]  }
   0x1   :  { %v14_v0 = vstv %s910_s4  ;;  %v16_v1 = vstv %s914_s5  ;;  %v18_v2 = vstv %s915_s6 }
   0x2   :  { %15 = vst [vmem:[#allocation2] sm:$0x1] %v14_v0  ;;  %17 = vst [vmem:[#allocation3] sm:$0x1] %v16_v1 }
   0x3   :  { %19 = vst [vmem:[#allocation4] sm:$0x1] %v18_v2 }
   0x4 LB: > { %s736_s4 = sadd.s32 4294967295, %s774_s15   ;;  %p740_p0 = scmp.ge.s32.totalorder %s774_s15, 1  ;;  %s774_s15 = sphi %s838_s15, %s25_s15  }
   0x5   : > { %p293_p1 = scmp.lt.s32.totalorder %s774_s15, 3 }
   0x7   : > { %p294_p2 = pnand %p740_p0, %p293_p1 }
   0x8   : > { %p328_p3 = scmp.lt.s32.totalorder (!%p294_p2), %s736_s4, 1 }
   0x9   : > { %297 = sbr.rel (%p294_p2) target bundleno = 694 (0x2b6), region = 56 }
   0xe   : > { %s917_s4 = smov (!%p328_p3, %s736_s4), 1  ;;  %vm345_vm0 = vcmask 31744   ;;  %v744_v35 = vld [vmem:[%s907_s1] ss:$0 sm:$0xff]  ;;  %vm463_vm1 = vcmask 261120   ;;  %vm584_vm2 = vcmask 1043456  }
   0xf   : > { %s753_s5 = sshll.u32 %s917_s4, 6  ;;  %v745_v42 = vld [vmem:[%s908_s2] ss:$0 sm:$0xff]  ;;  %s743_s30 = sshll.u32 %s917_s4, 1 }
  0x10   : > { %s332_s17 = scalar_lea.vmem %s906_s0, %s753_s5  ;;  %v746_v56 = vld [vmem:[%s909_s3] ss:$0 sm:$0xff]  ;;  %s336_s12 = scalar_lea.vmem %s913_s9, %s743_s30 }
  0x11   : > { %v339_v3 = vld [vmem:[%s332_s17 + $0x10] sm:$0xff]  ;;  %v337_v4 = vld [vmem:[%s332_s17] sm:$0xff]  ;;  %v340_v5 = vld [vmem:[%s332_s17 + $0x18] sm:$0xff] }
  0x12   : > { %v352_v6 = vsel %vm345_vm0, %v339_v3, -inf  ;;  %v346_v7 = vsel %vm345_vm0, %v337_v4, -inf  ;;  %v338_v8 = vld [vmem:[%s332_s17 + $0x8] sm:$0xff]  ;;  %v355_v9 = vsel %vm345_vm0, %v340_v5, -inf  ;;  %v341_v12 = vld [vmem:[%s332_s17 + $0x20] sm:$0xff]  ;;  %v344_v15 = vld [vmem:[%s332_s17 + $0x38] sm:$0xff] }
  0x13   : > { %353 = vmax.xlane.f32.xlu1 %v352_v6  ;;  %347 = vmax.xlane.f32.xlu0 %v346_v7  ;;  %v349_v10 = vsel %vm345_vm0, %v338_v8, -inf  ;;  %v342_v11 = vld [vmem:[%s332_s17 + $0x28] sm:$0xff]  ;;  %v358_v14 = vsel %vm345_vm0, %v341_v12, -inf  ;;  %v343_v16 = vld [vmem:[%s332_s17 + $0x30] sm:$0xff]  ;;  %v367_v17 = vsel %vm345_vm0, %v344_v15, -inf  ;;  %v373_v19 = vsel %vm345_vm0, %v338_v8, inf }
  0x14   : > { %v361_v13 = vsel %vm345_vm0, %v342_v11, -inf  ;;  %v364_v18 = vsel %vm345_vm0, %v343_v16, -inf  ;;  %v370_v20 = vsel %vm345_vm0, %v337_v4, inf  ;;  %v379_v21 = vsel %vm345_vm0, %v340_v5, inf }
  0x15   : > { %v376_v22 = vsel %vm345_vm0, %v339_v3, inf  ;;  %v385_v23 = vsel %vm345_vm0, %v342_v11, inf  ;;  %v382_v24 = vsel %vm345_vm0, %v341_v12, inf  ;;  %v391_v25 = vsel %vm345_vm0, %v344_v15, inf }
  0x16   : > { %v388_v26 = vsel %vm345_vm0, %v343_v16, inf }
  0x17   : > { %356 = vmax.xlane.f32.xlu1 %v355_v9  ;;  %350 = vmax.xlane.f32.xlu0 %v349_v10 }
  0x1b   : > { %362 = vmax.xlane.f32.xlu1 %v361_v13  ;;  %359 = vmax.xlane.f32.xlu0 %v358_v14 }
  0x1f   : > { %368 = vmax.xlane.f32.xlu1 %v367_v17  ;;  %365 = vmax.xlane.f32.xlu0 %v364_v18 }
  0x23   : > { %374 = vmin.xlane.f32.xlu1 %v373_v19  ;;  %371 = vmin.xlane.f32.xlu0 %v370_v20 }
  0x27   : > { %380 = vmin.xlane.f32.xlu1 %v379_v21  ;;  %377 = vmin.xlane.f32.xlu0 %v376_v22 }
  0x2b   : > { %386 = vmin.xlane.f32.xlu1 %v385_v23  ;;  %383 = vmin.xlane.f32.xlu0 %v382_v24 }
  0x2f   : > { %392 = vmin.xlane.f32.xlu1 %v391_v25  ;;  %389 = vmin.xlane.f32.xlu0 %v388_v26 }
  0x9c   : > { %v354_v27 = vpop.xlane.xlu1 %353  ;;  %v348_v28 = vpop.xlane.xlu0 %347 }
  0x9d   : > { %v401_v38 = vmul.f32 %v744_v35, %v348_v28  ;;  %v403_v45 = vmul.f32 %v744_v35, %v354_v27 }
  0xa0   : > { %v357_v29 = vpop.xlane.xlu1 %356  ;;  %v351_v30 = vpop.xlane.xlu0 %350 }
  0xa1   : > { %v402_v39 = vmul.f32 %v744_v35, %v351_v30  ;;  %v404_v46 = vmul.f32 %v744_v35, %v357_v29 }
  0xa4   : > { %v363_v31 = vpop.xlane.xlu1 %362  ;;  %v360_v32 = vpop.xlane.xlu0 %359 }
  0xa5   : > { %v406_v58 = vmul.f32 %v744_v35, %v363_v31  ;;  %v405_v59 = vmul.f32 %v744_v35, %v360_v32 }
  0xa8   : > { %v369_v33 = vpop.xlane.xlu1 %368  ;;  %v366_v34 = vpop.xlane.xlu0 %365 }
  0xa9   : > { %v408_v8 = vmul.f32 %v744_v35, %v369_v33  ;;  %v407_v16 = vmul.f32 %v744_v35, %v366_v34 }
  0xac   : > { %v375_v36 = vpop.xlane.xlu1 %374  ;;  %v372_v37 = vpop.xlane.xlu0 %371 }
  0xad   : > { %v410_v40 = vmul.f32 %v744_v35, %v375_v36  ;;  %v409_v41 = vmul.f32 %v744_v35, %v372_v37 }
  0xaf   : > { %v418_v43 = vmax.f32 %v402_v39, %v410_v40  ;;  %v417_v44 = vmax.f32 %v401_v38, %v409_v41  ;;  %v776_v38 = vmov 0  }
  0xb0   : > { %v381_v47 = vpop.xlane.xlu1 %380  ;;  %v378_v48 = vpop.xlane.xlu0 %377  ;;  %766 = vset.pattern.permute.xlu1 %v776_v38  ;;  %765 = vset.pattern.permute.xlu0 %v776_v38 }
  0xb1   : > { %v433_v49 = vadd.f32 %v745_v42, %v418_v43  ;;  %v432_v50 = vadd.f32 %v745_v42, %v417_v44  ;;  %v412_v51 = vmul.f32 %v744_v35, %v381_v47  ;;  %v411_v52 = vmul.f32 %v744_v35, %v378_v48  ;;  %v747_v43 = vld [vmem:[#allocation2] ss:$0 sm:$0xff] }
  0xb3   : > { %v420_v53 = vmax.f32 %v404_v46, %v412_v51  ;;  %v419_v54 = vmax.f32 %v403_v45, %v411_v52  ;;  %v441_v55 = vmax.f32 %v433_v49, 0.0  ;;  %v440_v57 = vmax.f32 %v432_v50, 0.0 }
  0xb4   : > { %v387_v60 = vpop.xlane.xlu1 %386  ;;  %v384_v61 = vpop.xlane.xlu0 %383 }
  0xb5   : > { %v435_v62 = vadd.f32 %v745_v42, %v420_v53  ;;  %v434_v63 = vadd.f32 %v745_v42, %v419_v54  ;;  %v414_v0 = vmul.f32 %v744_v35, %v387_v60  ;;  %v413_v1 = vmul.f32 %v744_v35, %v384_v61 }
  0xb6   : > { %v456_v2 = vmul.f32 %v746_v56, %v441_v55  ;;  %v455_v3 = vmul.f32 %v746_v56, %v440_v57 }
  0xb7   : > { %v422_v4 = vmax.f32 %v406_v58, %v414_v0  ;;  %v421_v5 = vmax.f32 %v405_v59, %v413_v1  ;;  %v443_v6 = vmax.f32 %v435_v62, 0.0  ;;  %v442_v7 = vmax.f32 %v434_v63, 0.0 }
  0xb8   : > { %v393_v9 = vpop.xlane.xlu1 %392  ;;  %v467_v10 = vsel %vm463_vm1, %v456_v2, 0.0  ;;  %v464_v11 = vsel %vm463_vm1, %v455_v3, 0.0  ;;  %v390_v12 = vpop.xlane.xlu0 %389 }
  0xb9   : > { %v437_v13 = vadd.f32 %v745_v42, %v422_v4  ;;  %v436_v14 = vadd.f32 %v745_v42, %v421_v5  ;;  %v416_v15 = vmul.f32 %v744_v35, %v393_v9  ;;  %468 = vadd.xlane.f32.xlu1 %v467_v10  ;;  %465 = vadd.xlane.f32.xlu0 %v464_v11  ;;  %v777_v10 = vmov 0.0   ;;  %v518_v11 = vld [vmem:[%s911_s7 + $0x8] sm:$0xff] }
  0xba   : > { %v415_v17 = vmul.f32 %v744_v35, %v390_v12  ;;  %v458_v18 = vmul.f32 %v746_v56, %v443_v6  ;;  %v457_v19 = vmul.f32 %v746_v56, %v442_v7  ;;  %v553_v6 = vld [vmem:[#allocation3] sm:$0x1]  ;;  %v566_v7 = vld [vmem:[#allocation4] sm:$0x1]  ;;  %653 = vmatprep.mubr.f32.mxu0 %v777_v10  ;;  %vm520_vm3 = vcmp.gt.f32.partialorder %v518_v11, 0.5 }
  0xbb   : > { %v424_v20 = vmax.f32 %v408_v8, %v416_v15  ;;  %v445_v21 = vmax.f32 %v437_v13, 0.0  ;;  %v444_v22 = vmax.f32 %v436_v14, 0.0  ;;  %v578_v8 = vld [vmem:[%s912_s8] sm:$0xff] }
  0xbc   : > { %v423_v23 = vmax.f32 %v407_v16, %v415_v17  ;;  %v473_v24 = vsel %vm463_vm1, %v458_v18, 0.0  ;;  %v470_v25 = vsel %vm463_vm1, %v457_v19, 0.0  ;;  %v580_v9 = vcombine.high %v578_v8, %v578_v8  ;;  %v517_v12 = vld [vmem:[%s911_s7] sm:$0xff] }
  0xbd   : > { %v439_v26 = vadd.f32 %v745_v42, %v424_v20  ;;  %474 = vadd.xlane.f32.xlu1 %v473_v24  ;;  %471 = vadd.xlane.f32.xlu0 %v470_v25  ;;  %v460_v27 = vmul.f32 %v746_v56, %v445_v21  ;;  %v459_v28 = vmul.f32 %v746_v56, %v444_v22  ;;  %vm519_vm4 = vcmp.gt.f32.partialorder %v517_v12, 0.5 }
  0xbe   : > { %v438_v29 = vadd.f32 %v745_v42, %v423_v23  ;;  %748 = vmatprep.subr.msk.mxu0 %vm584_vm2, %v580_v9  ;;  %v559_v24 = vlaneseq }
  0xbf   : > { %v479_v30 = vsel %vm463_vm1, %v460_v27, 0.0  ;;  %v476_v31 = vsel %vm463_vm1, %v459_v28, 0.0  ;;  %v447_v32 = vmax.f32 %v439_v26, 0.0  ;;  %749 = vmatpush1.msk.msra.mxu0 %vm584_vm2, %v578_v8 }
  0xc0   : > { %v446_v33 = vmax.f32 %v438_v29, 0.0  ;;  %v560_v29 = vshrl.u32 %v559_v24, 7  ;;  %vm680_vm5 = vcmp.lt.s32.totalorder %v559_v24, 256 }
  0xc1   : > { %480 = vadd.xlane.f32.xlu1 %v479_v30  ;;  %477 = vadd.xlane.f32.xlu0 %v476_v31  ;;  %v462_v34 = vmul.f32 %v746_v56, %v447_v32 }
  0xc2   : > { %v461_v35 = vmul.f32 %v746_v56, %v446_v33  ;;  %v561_v33 = vsub.s32 0, %v560_v29 }
  0xc3   : > { %v485_v36 = vsel %vm463_vm1, %v462_v34, 0.0 }
  0xc4   : > { %v482_v37 = vsel %vm463_vm1, %v461_v35, 0.0 }
  0xc5   : > { %486 = vadd.xlane.f32.xlu1 %v485_v36  ;;  %483 = vadd.xlane.f32.xlu0 %v482_v37 }
 0x142   : > { %v469_v39 = vpop.xlane.xlu1 %468  ;;  %v466_v40 = vpop.xlane.xlu0 %465 }
 0x143   : > { %v496_v48 = vadd.f32 %v747_v43, %v469_v39  ;;  %v495_v49 = vadd.f32 %v747_v43, %v466_v40 }
 0x145   : > { %v504_v58 = vmax.f32 %v496_v48, 0.0  ;;  %v503_v59 = vmax.f32 %v495_v49, 0.0  ;;  %v778_v49 = vmov 1966171168  }
 0x146   : > { %v475_v41 = vpop.xlane.xlu1 %474  ;;  %v472_v42 = vpop.xlane.xlu0 %471 }
 0x147   : > { %v498_v46 = vadd.f32 %v747_v43, %v475_v41  ;;  %v497_v47 = vadd.f32 %v747_v43, %v472_v42 }
 0x149   : > { %v506_v54 = vmax.f32 %v498_v46, 0.0  ;;  %v505_v55 = vmax.f32 %v497_v47, 0.0 }
 0x14a   : > { %v481_v44 = vpop.xlane.xlu1 %480  ;;  %v478_v45 = vpop.xlane.xlu0 %477 }
 0x14b   : > { %v500_v50 = vadd.f32 %v747_v43, %v481_v44  ;;  %v499_v51 = vadd.f32 %v747_v43, %v478_v45  ;;  %v512_v0 = vmax.f32 %v504_v58, %v506_v54  ;;  %v511_v1 = vmax.f32 %v503_v59, %v505_v55 }
 0x14d   : > { %v508_v60 = vmax.f32 %v500_v50, 0.0  ;;  %v507_v61 = vmax.f32 %v499_v51, 0.0  ;;  %v664_v50 = vunpack.c.l.s4 %v778_v49 }
 0x14e   : > { %v487_v52 = vpop.xlane.xlu1 %486  ;;  %v484_v53 = vpop.xlane.xlu0 %483 }
 0x14f   : > { %v502_v56 = vadd.f32 %v747_v43, %v487_v52  ;;  %v501_v57 = vadd.f32 %v747_v43, %v484_v53  ;;  %v665_v51 = vunpack.c.0.s8 %v664_v50 }
 0x151   : > { %v510_v62 = vmax.f32 %v502_v56, 0.0  ;;  %v509_v63 = vmax.f32 %v501_v57, 0.0  ;;  %v668_v53 = vsub.s32 %v665_v51, %v560_v29 }
 0x153   : > { %v514_v2 = vmax.f32 %v508_v60, %v510_v62  ;;  %v513_v3 = vmax.f32 %v507_v61, %v509_v63 }
 0x155   : > { %v516_v4 = vmax.f32 %v512_v0, %v514_v2  ;;  %v515_v5 = vmax.f32 %v511_v1, %v513_v3 }
 0x157   : > { %528 = vperm.xlu1 %766, %v516_v4   ;;  %523 = vperm.xlu0 %765, %v515_v5  }
 0x15b   : > { %556 = vperm.xlu1 %766, %v553_v6  }
 0x15f   : > { %569 = vperm.xlu1 %766, %v566_v7  }
 0x1d2   : > { %v529_v13 = vpop.permute.xlu1 %528  ;;  %v524_v14 = vpop.permute.xlu0 %523 }
 0x1d3   : > { %v532_v15 = vsel %vm520_vm3, %v529_v13, -1e+30  ;;  %v543_v16 = vsel %vm520_vm3, %v529_v13, 1e+30  ;;  %v531_v17 = vsel %vm519_vm4, %v524_v14, -1e+30 }
 0x1d4   : > { %v534_v18 = vsel %vm345_vm0, %v532_v15, -inf  ;;  %v545_v19 = vsel %vm345_vm0, %v543_v16, inf  ;;  %v533_v20 = vsel %vm345_vm0, %v531_v17, -inf  ;;  %v542_v21 = vsel %vm519_vm4, %v524_v14, 1e+30 }
 0x1d5   : > { %v535_v22 = vmax.f32 %v533_v20, %v534_v18  ;;  %v544_v23 = vsel %vm345_vm0, %v542_v21, inf }
 0x1d6   : > { %v546_v25 = vmin.f32 %v544_v23, %v545_v19  ;;  %v557_v34 = vpop.permute.xlu1 %556 }
 0x1d7   : > { %v536_v26 = vrot.slane %v535_v22, 4  ;;  %v562_v40 = vrot.slane %v557_v34, %v561_v33 }
 0x1d8   : > { %v547_v27 = vrot.slane %v546_v25, 4 }
 0x1d9   : > { %v537_v28 = vmax.f32 %v535_v22, %v536_v26 }
 0x1da   : > { %v548_v30 = vmin.f32 %v546_v25, %v547_v27  ;;  %v570_v43 = vpop.permute.xlu1 %569 }
 0x1db   : > { %v538_v31 = vrot.slane %v537_v28, 2  ;;  %v575_v46 = vrot.slane %v570_v43, %v561_v33 }
 0x1dc   : > { %v549_v32 = vrot.slane %v548_v30, 2 }
 0x1dd   : > { %v539_v35 = vmax.f32 %v537_v28, %v538_v31 }
 0x1de   : > { %v550_v36 = vmin.f32 %v548_v30, %v549_v32 }
 0x1df   : > { %v540_v37 = vrot.slane %v539_v35, 1 }
 0x1e0   : > { %v551_v38 = vrot.slane %v550_v36, 1 }
 0x1e1   : > { %v541_v39 = vmax.f32 %v539_v35, %v540_v37 }
 0x1e2   : > { %v552_v41 = vmin.f32 %v550_v36, %v551_v38 }
 0x1e3   : > { %v563_v42 = vmul.f32 %v562_v40, %v541_v39 }
 0x1e4   : > { %v564_v44 = vmul.f32 %v562_v40, %v552_v41 }
 0x1e6   : > { %v565_v45 = vmax.f32 %v563_v42, %v564_v44 }
 0x1e8   : > { %v576_v47 = vadd.f32 %v575_v46, %v565_v45 }
 0x1ea   : > { %v577_v48 = vmax.f32 %v576_v47, 0.0 }
 0x1ec   : > { %750 = vmatmul.mubr.msk.f32.vlgmr.msra.gmra.mxu0 %vm345_vm0, %v577_v48 }
 0x2ac   : > { %v655_v52 = vpop.f32.mrf.mxu0 }
 0x2ae   : > { %v657_v54 = vpop.f32.mrf.mxu0 }
 0x2af   : > { %v662_v55 = vcombine.low %v655_v52, %v657_v54 }
 0x2b1   : > { %v669_v56 = vrot.slane %v662_v55, %v668_v53 }
 0x2b3   : > { %v676_v57 = vrot.slane %v669_v56, %v668_v53 }
 0x2b5   : > { %682 = vst.msk [vmem:[%s336_s12] sm:$0x3] %vm680_vm5, %v676_v57 }
 0x2b6 PF: > { %s25_s15 = sadd.s32 1, %s774_s15  }
 0x2b7   : > { %p22_p4 = scmp.ge.s32.totalorder %s25_s15, 4  }
 0x2b9   :  { %24 = sbr.rel (!%p22_p4) target bundleno = 4 (0x4), region = 86 }

</bundles_post_ra>
